<compile_context>
chip_gen: v5e
topology: v5e:2x2
jax: 0.10.0
libtpu: 0.0.40
codegen_flags: <defaults>
</compile_context>

<pallas_src>
import math

import jax
import jax.numpy as jnp
from jax import lax
from jax.experimental import pallas as pl
from jax.experimental.pallas import tpu as pltpu


# ---------------------------------------------------------------------------
# Kernel bodies
# ---------------------------------------------------------------------------

def _linear_relu_kernel(s_ref, w_ref, b_ref, o_ref):
    # Natural layout (single-block path).
    # s_ref: (B, n_in)  (size-1 dim of `state` squeezed away by BlockSpec)
    # w_ref: (n_in, n_out)   b_ref: (1, n_out)   o_ref: (B, n_out)
    x = s_ref[...].astype(jnp.float32)                        # fused .float()
    y = jnp.dot(x, w_ref[...], preferred_element_type=jnp.float32)
    o_ref[...] = jnp.maximum(y + b_ref[...], 0.0)             # bias + ReLU


def _linear_relu_t_kernel(s_ref, w_ref, bt_ref, ot_ref):
    # Lane-dense (transposed-output) body for the large-B gridded path.
    # n_out is tiny (8); a (TB, n_out) output would use 8/128 lanes and store
    # as masked vst.msk.  Computing y^T = W^T @ x^T puts the batch dim on
    # lanes (TB multiple of 128) -> unmasked stores, ~16x less store traffic.
    # s_ref: (TB, n_in)   w_ref: (n_in, n_out)   bt_ref: (n_out, 1)
    # ot_ref: (n_out, TB)
    x = s_ref[...].astype(jnp.float32)                        # fused .float()
    y_t = lax.dot_general(
        w_ref[...], x,
        dimension_numbers=(((0,), (1,)), ((), ())),           # -> (n_out, TB)
        preferred_element_type=jnp.float32,
    )
    ot_ref[...] = jnp.maximum(y_t + bt_ref[...], 0.0)


# ---------------------------------------------------------------------------
# VMEM-derived sizing
# ---------------------------------------------------------------------------

def _vmem_capacity_bytes():
    try:
        info = pltpu.get_tpu_info()
        cap = getattr(info, "vmem_capacity_bytes", None)
        if cap:
            return int(cap)
    except Exception:
        pass
    return 64 << 20  # conservative fallback: v7x physical VMEM


def _single_block_cap(n_in, n_out, state_itemsize):
    """Largest batch we run as a single grid step (derived from VMEM).

    Pallas double-buffers each operand, hence the factor 2.  Budget = 1/8 of
    physical VMEM keeps us comfortably under every generation's scoped default
    (v5e/v6e 128 MiB phys -> cap 32768; v7x 64 MiB phys -> cap ~26k).
    """
    budget = _vmem_capacity_bytes() // 8
    per_row = 2 * (n_in * state_itemsize + n_out * 4)
    fixed = 2 * (n_in * n_out * 4 + n_out * 4)
    cap = (budget - fixed) // max(per_row, 1)
    return int(max(256, min(32768, cap)))


# ---------------------------------------------------------------------------
# Forward wrapper
# ---------------------------------------------------------------------------

def network_forward(state, w, b, *, max_single_block_batch=None, batch_tile=4096):
    """state: (B, 1, n_in) any float dtype -> (B, n_out) float32.

    Matches torch: relu(Linear(squeeze(state, 1).float())).
    """
    B, mid, n_in = state.shape
    assert mid == 1, "expected state of shape (B, 1, n_input)"
    n_out = w.shape[1]

    if max_single_block_batch is None:
        max_single_block_batch = _single_block_cap(n_in, n_out, state.dtype.itemsize)

    cost = pl.CostEstimate(
        flops=2 * B * n_in * n_out,
        transcendentals=0,
        bytes_accessed=(
            state.size * state.dtype.itemsize
            + w.size * w.dtype.itemsize
            + b.size * b.dtype.itemsize
            + B * n_out * 4
        ),
    )

    if B <= max_single_block_batch:
        # ---- single block: no per-step grid overhead; any B (block == full dims).
        return pl.pallas_call(
            _linear_relu_kernel,
            out_shape=jax.ShapeDtypeStruct((B, n_out), jnp.float32),
            grid_spec=pltpu.PrefetchScalarGridSpec(
                num_scalar_prefetch=0,
                grid=(1,),
                in_specs=[
                    # (B, 1->squeezed, n_in); kernel sees (B, n_in)
                    pl.BlockSpec((B, pl.Squeezed(), n_in), lambda i: (i, 0, 0)),
                    pl.BlockSpec((n_in, n_out), lambda i: (0, 0)),
                    pl.BlockSpec((1, n_out), lambda i: (0, 0)),
                ],
                out_specs=pl.BlockSpec((B, n_out), lambda i: (i, 0)),
            ),
            compiler_params=pltpu.CompilerParams(
                dimension_semantics=("arbitrary",),
                vmem_limit_bytes=32 << 20,
            ),
            cost_estimate=cost,
        )(state, w, b)

    # ---- large rollout batches: big MXU/HBM-friendly tile, lane-dense
    # transposed output, masked tail via cdiv grid, batch axis "parallel"
    # (v7x shards it across its 2 TensorCores; inert on v5e/v6e).
    batch_tile = min(batch_tile, B)
    b_t = jnp.reshape(b, (n_out, 1))  # bias broadcast over batch lanes

    out_t = pl.pallas_call(
        _linear_relu_t_kernel,
        out_shape=jax.ShapeDtypeStruct((n_out, B), jnp.float32),
        grid_spec=pltpu.PrefetchScalarGridSpec(
            num_scalar_prefetch=0,
            grid=(pl.cdiv(B, batch_tile),),
            in_specs=[
                pl.BlockSpec((batch_tile, pl.Squeezed(), n_in), lambda i: (i, 0, 0)),
                # W and bias resident across grid steps (constant index)
                pl.BlockSpec((n_in, n_out), lambda i: (0, 0)),
                pl.BlockSpec((n_out, 1), lambda i: (0, 0)),
            ],
            out_specs=pl.BlockSpec((n_out, batch_tile), lambda i: (0, i)),
        ),
        compiler_params=pltpu.CompilerParams(
            dimension_semantics=("parallel",),
            vmem_limit_bytes=32 << 20,
        ),
        cost_estimate=cost,
    )(state, w, b_t)

    # One cheap XLA transpose back to the module's (B, n_out) layout.
    return out_t.T


# ---------------------------------------------------------------------------
# Init + reference
# ---------------------------------------------------------------------------

def init_params(key, n_input, n_output):
    """Xavier-uniform init with gain = calculate_gain('relu') = sqrt(2), matching
    nn.init.xavier_uniform_ on the (n_output, n_input) torch weight; bias matches
    torch Linear's default U(-1/sqrt(fan_in), 1/sqrt(fan_in))."""
    kw, kb = jax.random.split(key)
    gain = math.sqrt(2.0)
    fan_in, fan_out = n_input, n_output
    limit = gain * math.sqrt(6.0 / (fan_in + fan_out))
    # stored as (n_input, n_output) == torch weight transposed
    w = jax.random.uniform(kw, (n_input, n_output), jnp.float32, -limit, limit)
    b_limit = 1.0 / math.sqrt(fan_in)
    b = jax.random.uniform(kb, (1, n_output), jnp.float32, -b_limit, b_limit)
    return w, b


def _reference(state, w, b):
    return jnp.maximum(jnp.squeeze(state, 1).astype(jnp.float32) @ w + b, 0.0)


if __name__ == "__main__":
    key = jax.random.PRNGKey(0)
    k1, k2, k3, kp = jax.random.split(key, 4)

    n_input, n_output = 32, 8
    w, b = init_params(kp, n_input, n_output)

    # Primary small-shape check (B=16): single-block path.
    B = 16
    state = jax.random.normal(k1, (B, 1, n_input), jnp.float32)
    out = jax.block_until_ready(network_forward(state, w, b))
    ref = _reference(state, w, b)
    assert out.shape == (B, n_output)
    assert jnp.allclose(out, ref, atol=1e-5, rtol=1e-5)

    # Robustness: batch not a multiple of 8 (still single full block).
    B2 = 10
    state2 = jax.random.normal(k2, (B2, 1, n_input), jnp.float32)
    out2 = jax.block_until_ready(network_forward(state2, w, b))
    ref2 = _reference(state2, w, b)
    assert out2.shape == (B2, n_output)
    assert jnp.allclose(out2, ref2, atol=1e-5, rtol=1e-5)

    # Force the gridded lane-dense (transposed) path, incl. a partial tail block.
    B3 = 5000
    state3 = jax.random.normal(k3, (B3, 1, n_input), jnp.float32)
    out3 = jax.block_until_ready(
        network_forward(state3, w, b, max_single_block_batch=2048, batch_tile=4096)
    )
    ref3 = _reference(state3, w, b)
    assert out3.shape == (B3, n_output)
    assert jnp.allclose(out3, ref3, atol=1e-5, rtol=1e-5)

    print("KERNEL_OK")
</pallas_src>

<mosaic_0001>
module attributes {stable_mosaic.version = 11 : i64} {
  func.func @_linear_relu_kernel(%arg0: i32, %arg1: memref<16x1x32xf32, #tpu.memory_space<vmem>>, %arg2: memref<32x8xf32, #tpu.memory_space<vmem>>, %arg3: memref<1x8xf32, #tpu.memory_space<vmem>>, %arg4: memref<16x8xf32, #tpu.memory_space<vmem>>) attributes {dimension_semantics = [#tpu.dimension_semantics<arbitrary>], iteration_bounds = array<i64: 1>, scalar_prefetch = 0 : i64, scratch_operands = 0 : i64, tpu.core_type = #tpu.core_type<tc>, window_params = [{transform_indices = @transform_0, window_bounds = array<i64: 16, 1, 32>}, {pipeline_mode = #tpu.pipeline_mode<synchronous>, transform_indices = @transform_1, window_bounds = array<i64: 32, 8>}, {pipeline_mode = #tpu.pipeline_mode<synchronous>, transform_indices = @transform_2, window_bounds = array<i64: 1, 8>}, {transform_indices = @transform_3, window_bounds = array<i64: 16, 8>}]} {
    %c0 = arith.constant 0 : index
    %c0_0 = arith.constant 0 : index
    %c0_1 = arith.constant 0 : index
    %0 = vector.load %arg1[%c0, %c0_0, %c0_1] : memref<16x1x32xf32, #tpu.memory_space<vmem>>, vector<16x1x32xf32>
    %1 = vector.shape_cast %0 : vector<16x1x32xf32> to vector<16x32xf32>
    %c0_2 = arith.constant 0 : index
    %c0_3 = arith.constant 0 : index
    %2 = vector.load %arg2[%c0_2, %c0_3] : memref<32x8xf32, #tpu.memory_space<vmem>>, vector<32x8xf32>
    %cst = arith.constant dense<0.000000e+00> : vector<16x8xf32>
    %3 = tpu.matmul %1, %2, %cst {dimension_numbers = #tpu.dot_dimension_numbers<[1], [0], [0], [1], [0, 0, 1, 1], [], []>} : vector<16x32xf32>, vector<32x8xf32>, vector<16x8xf32> -> vector<16x8xf32>
    %c0_4 = arith.constant 0 : index
    %c0_5 = arith.constant 0 : index
    %4 = vector.load %arg3[%c0_4, %c0_5] : memref<1x8xf32, #tpu.memory_space<vmem>>, vector<1x8xf32>
    %5 = vector.broadcast %4 : vector<1x8xf32> to vector<16x8xf32>
    %6 = arith.addf %3, %5 : vector<16x8xf32>
    %cst_6 = arith.constant 0.000000e+00 : f32
    %7 = vector.broadcast %cst_6 : f32 to vector<16x8xf32>
    %8 = arith.maximumf %6, %7 : vector<16x8xf32>
    %c0_7 = arith.constant 0 : index
    %c0_8 = arith.constant 0 : index
    %9 = vector.load %arg4[%c0_7, %c0_8] : memref<16x8xf32, #tpu.memory_space<vmem>>, vector<16x8xf32>
    tpu.vector_store %arg4[%c0_7, %c0_8], %8 {strides = array<i32>} : memref<16x8xf32, #tpu.memory_space<vmem>>, vector<16x8xf32>,
    return
  }
  func.func @transform_0(%arg0: i32) -> (i32, i32, i32) {
    %c0_i32 = arith.constant 0 : i32
    %c0_i32_0 = arith.constant 0 : i32
    %c0_i32_1 = arith.constant 0 : i32
    return %arg0, %c0_i32, %c0_i32_0 : i32, i32, i32
  }
  func.func @transform_1(%arg0: i32) -> (i32, i32) {
    %c0_i32 = arith.constant 0 : i32
    %c0_i32_0 = arith.constant 0 : i32
    %c0_i32_1 = arith.constant 0 : i32
    return %c0_i32, %c0_i32_0 : i32, i32
  }
  func.func @transform_2(%arg0: i32) -> (i32, i32) {
    %c0_i32 = arith.constant 0 : i32
    %c0_i32_0 = arith.constant 0 : i32
    %c0_i32_1 = arith.constant 0 : i32
    return %c0_i32, %c0_i32_0 : i32, i32
  }
  func.func @transform_3(%arg0: i32) -> (i32, i32) {
    %c0_i32 = arith.constant 0 : i32
    %c0_i32_0 = arith.constant 0 : i32
    return %arg0, %c0_i32 : i32, i32
  }
}

</mosaic_0001>

<bundles_post_ra>
// kernel: tpu_custom_call.1
= control target key start
LH: loop header
LB: loop body
LE: loop exit
PB: predicated region body
PF: predicated region fallthrough
CT: control target
= control target key end

     0   :  { %vm79_vm0 = vcmask 261120   ;;  %vm109_vm1 = vcmask 64512   ;;  %s214_s1 = inlined_call_operand.vmem [shape: f32[32,8], index: 1, kind: input, shape index: {}]   ;;  %s215_s0 = inlined_call_operand.vmem [shape: f32[16,1,32], index: 0, kind: input, shape index: {}]   ;;  %s216_s2 = inlined_call_operand.vmem [shape: f32[1,8], index: 2, kind: input, shape index: {}]   ;;  %s217_s3 = inlined_call_operand.vmem [shape: f32[16,8], index: 3, kind: output, shape index: {}]  }
   0x1   :  { %v33_v0 = vld [vmem:[%s214_s1 + $0x18] sm:$0xff]  ;;  %v32_v1 = vld [vmem:[%s214_s1 + $0x10] sm:$0xff]  ;;  %v14_v2 = vld [vmem:[%s215_s0] sm:$0x1] }
   0x2   :  { %96 = vmatpush.msra.mxu0 %v33_v0  ;;  %118 = vmatpush.msra.mxu1 %v33_v0  ;;  %v31_v3 = vld [vmem:[%s214_s1 + $0x8] sm:$0xff]  ;;  %v15_v4 = vld [vmem:[%s215_s0 + $0x1] sm:$0x1]  ;;  %v16_v5 = vld [vmem:[%s215_s0 + $0x2] sm:$0x1] }
   0x3   :  { %v30_v6 = vld [vmem:[%s214_s1] sm:$0xff]  ;;  %54 = vst [vmem:[#allocation1] ss:$9 sm:$0xff] %v14_v2  ;;  %v22_v12 = vld [vmem:[%s215_s0 + $0x8] sm:$0x1] }
   0x4   :  { %97 = vmatpush.msra.mxu0 %v32_v1  ;;  %119 = vmatpush.msra.mxu1 %v32_v1  ;;  %v17_v7 = vld [vmem:[%s215_s0 + $0x3] sm:$0x1]  ;;  %v18_v8 = vld [vmem:[%s215_s0 + $0x4] sm:$0x1]  ;;  %56 = vst [vmem:[#allocation1 + $0x1] ss:$9 sm:$0xff] %v15_v4 }
   0x5   :  { %v19_v9 = vld [vmem:[%s215_s0 + $0x5] sm:$0x1]  ;;  %58 = vst [vmem:[#allocation1 + $0x2] ss:$9 sm:$0xff] %v16_v5  ;;  %v20_v10 = vld [vmem:[%s215_s0 + $0x6] sm:$0x1] }
   0x6   :  { %98 = vmatpush.msra.mxu0 %v31_v3  ;;  %120 = vmatpush.msra.mxu1 %v31_v3  ;;  %60 = vst [vmem:[#allocation1 + $0x3] ss:$9 sm:$0xff] %v17_v7  ;;  %v21_v11 = vld [vmem:[%s215_s0 + $0x7] sm:$0x1]  ;;  %v23_v13 = vld [vmem:[%s215_s0 + $0x9] sm:$0x1] }
   0x7   :  { %62 = vst [vmem:[#allocation1 + $0x4] ss:$9 sm:$0xff] %v18_v8  ;;  %v24_v15 = vld [vmem:[%s215_s0 + $0xa] sm:$0x1]  ;;  %v25_v16 = vld [vmem:[%s215_s0 + $0xb] sm:$0x1] }
   0x8   :  { %99 = vmatpush.msra.mxu0 %v30_v6  ;;  %121 = vmatpush.msra.mxu1 %v30_v6  ;;  %64 = vst [vmem:[#allocation1 + $0x5] ss:$9 sm:$0xff] %v19_v9  ;;  %v26_v17 = vld [vmem:[%s215_s0 + $0xc] sm:$0x1]  ;;  %v27_v18 = vld [vmem:[%s215_s0 + $0xd] sm:$0x1] }
   0x9   :  { %66 = vst [vmem:[#allocation1 + $0x6] ss:$9 sm:$0xff] %v20_v10  ;;  %v28_v19 = vld [vmem:[%s215_s0 + $0xe] sm:$0x1]  ;;  %v29_v20 = vld [vmem:[%s215_s0 + $0xf] sm:$0x1] }
   0xa   :  { %68 = vst [vmem:[#allocation1 + $0x7] ss:$9 sm:$0xff] %v21_v11  ;;  %v122_v22 = vld [vmem:[%s216_s2] ss:$0 sm:$0xff] }
  0x11   :  { %v69_v14 = vld [vmem:[#allocation1] sm:$0xff] }
  0x12   :  { %116 = vmatmul.msk.f32.vlgmr.msra.gmra.mxu0 %vm79_vm0, %v69_v14  ;;  %70 = vst [vmem:[#allocation1] ss:$9 sm:$0xff] %v22_v12 }
  0x13   :  { %71 = vst [vmem:[#allocation1 + $0x1] ss:$9 sm:$0xff] %v23_v13 }
  0x14   :  { %72 = vst [vmem:[#allocation1 + $0x2] ss:$9 sm:$0xff] %v24_v15 }
  0x15   :  { %73 = vst [vmem:[#allocation1 + $0x3] ss:$9 sm:$0xff] %v25_v16 }
  0x16   :  { %74 = vst [vmem:[#allocation1 + $0x4] ss:$9 sm:$0xff] %v26_v17 }
  0x17   :  { %75 = vst [vmem:[#allocation1 + $0x5] ss:$9 sm:$0xff] %v27_v18 }
  0x18   :  { %76 = vst [vmem:[#allocation1 + $0x6] ss:$9 sm:$0xff] %v28_v19 }
  0x19   :  { %77 = vst [vmem:[#allocation1 + $0x7] ss:$9 sm:$0xff] %v29_v20 }
  0x20   :  { %v78_v21 = vld [vmem:[#allocation1] sm:$0xff] }
  0x21   :  { %117 = vmatmul.msk.f32.vlgmr.msra.gmra.mxu1 %vm79_vm0, %v78_v21 }
  0x8f   :  { %v101_v23 = vpop.f32.mrf.mxu0 }
  0x90   :  { %v102_v24 = vadd.f32 %v122_v22, %v101_v23 }
  0x92   :  { %v107_v25 = vmax.f32 %v102_v24, 0.0 }
  0x94   :  { %110 = vst.msk [vmem:[%s217_s3] sm:$0xff] %vm109_vm1, %v107_v25 }
  0x9e   :  { %v104_v26 = vpop.f32.mrf.mxu1 }
  0x9f   :  { %v105_v27 = vadd.f32 %v122_v22, %v104_v26 }
  0xa1   :  { %v108_v28 = vmax.f32 %v105_v27, 0.0 }
  0xa3   :  { %111 = vst.msk [vmem:[%s217_s3 + $0x8] sm:$0xff] %vm109_vm1, %v108_v28 }

</bundles_post_ra>
